<compile_context>
chip_gen: v5e
topology: v5e:2x2
jax: 0.10.0
libtpu: 0.0.40
codegen_flags: <defaults>
</compile_context>

<pallas_src>
import functools

import jax
import jax.numpy as jnp
from jax.experimental import pallas as pl
from jax.experimental.pallas import tpu as pltpu


def _round_up(x, m):
    return ((x + m - 1) // m) * m


def ffn_kernel(x_ref, w1_ref, b1_ref, w2_ref, b2_ref, o_ref, *, activation):
    # x_ref:  (TM, Dp) bf16    w1_ref: (Dp, Hp) bf16    b1_ref: (1, Hp) f32
    # w2_ref: (Hp, Dp) bf16    b2_ref: (1, Dp) f32      o_ref:  (TM, Dp) f32
    h = jnp.dot(x_ref[...], w1_ref[...],
                preferred_element_type=jnp.float32) + b1_ref[...]
    if activation == "swish":
        # SiLU / swish: h * sigmoid(h). exp goes to the EUP; the approx
        # reciprocal also goes to the EUP, so the VALU only sees add/mul/cast.
        h = h * pl.reciprocal(1.0 + jnp.exp(-h), approx=True)
    else:  # ReLU branch of the original module
        h = jnp.maximum(h, 0.0)
    # TODO(synk): dropout is identity in eval mode; training-mode dropout would
    # use pltpu.prng_seed + pltpu.prng_random_bits for an in-kernel mask.
    h = h.astype(jnp.bfloat16)
    out = jnp.dot(h, w2_ref[...],
                  preferred_element_type=jnp.float32) + b2_ref[...]
    o_ref[...] = out.astype(o_ref.dtype)


def prepare_ffn_params(w1, b1, w2, b2):
    """One-time weight prep (outside the hot path): zero-pad D/H up to
    multiples of 128 for lane-dense layout and pre-cast weights to bf16.
    Biases stay f32 (added to the f32 accumulator)."""
    D, H = w1.shape
    Dp, Hp = _round_up(D, 128), _round_up(H, 128)
    w1p = jnp.pad(w1.astype(jnp.bfloat16), ((0, Dp - D), (0, Hp - H)))
    w2p = jnp.pad(w2.astype(jnp.bfloat16), ((0, Hp - H), (0, Dp - D)))
    b1p = jnp.pad(b1.astype(jnp.float32), (0, Hp - H)).reshape(1, Hp)
    b2p = jnp.pad(b2.astype(jnp.float32), (0, Dp - D)).reshape(1, Dp)
    return w1p, b1p, w2p, b2p


@functools.partial(jax.jit, static_argnames=("tm", "activation"))
def positionwise_ffn(x, w1p, b1p, w2p, b2p, *, tm=256, activation="swish"):
    """x: (B, S, D) float32. w1p/b1p/w2p/b2p from prepare_ffn_params
    (padded to Dp/Hp, weights bf16). Returns (B, S, D) float32."""
    B, S, D = x.shape
    Dp, Hp = w1p.shape
    M = B * S

    # Token tile: large enough to amortize per-step overhead and fill the MXU,
    # but shrink for tiny inputs so the grid keeps >= 2 parallel steps (keeps
    # both v7x TensorCores busy). Never below 8 sublanes.
    tm_eff = min(tm, max(8, _round_up(pl.cdiv(M, 2), 8)))
    Mp = _round_up(M, tm_eff)

    # Zero-pad tokens/features and cast activations to bf16 (f32 accumulation
    # in-kernel). Zero padding is exact: padded H columns see bias 0 -> act 0,
    # padded w2 rows/cols are 0, so the valid [:M, :D] slice is unaffected.
    x2 = x.reshape(M, D).astype(jnp.bfloat16)
    if (Mp, Dp) != (M, D):
        x2 = jnp.pad(x2, ((0, Mp - M), (0, Dp - D)))

    # NOTE(v7x): weights are fully VMEM-resident (constant index_map). In bf16
    # that is 2*Dp*Hp bytes per weight; for very large D*H on v7x (64 MiB VMEM)
    # add an H-reduction grid axis with a VMEM f32 accumulator instead of
    # shrinking tm.
    flops = 2 * 2 * Mp * Dp * Hp                              # two GEMMs
    bytes_accessed = (Mp * Dp * 2                             # x tiles (bf16)
                      + 2 * Dp * Hp * 2                       # w1 + w2 (bf16)
                      + (Hp + Dp) * 4                         # biases (f32)
                      + Mp * Dp * 4)                          # output (f32)

    out2 = pl.pallas_call(
        functools.partial(ffn_kernel, activation=activation),
        out_shape=jax.ShapeDtypeStruct((Mp, Dp), jnp.float32),
        grid_spec=pltpu.PrefetchScalarGridSpec(
            num_scalar_prefetch=0,
            grid=(Mp // tm_eff,),
            in_specs=[
                pl.BlockSpec((tm_eff, Dp), lambda i: (i, 0)),  # x tile
                pl.BlockSpec((Dp, Hp), lambda i: (0, 0)),      # w1 (resident)
                pl.BlockSpec((1, Hp), lambda i: (0, 0)),       # b1
                pl.BlockSpec((Hp, Dp), lambda i: (0, 0)),      # w2 (resident)
                pl.BlockSpec((1, Dp), lambda i: (0, 0)),       # b2
            ],
            out_specs=pl.BlockSpec((tm_eff, Dp), lambda i: (i, 0)),
        ),
        compiler_params=pltpu.CompilerParams(
            dimension_semantics=("parallel",),
            vmem_limit_bytes=64 * 1024 * 1024,
        ),
        cost_estimate=pl.CostEstimate(
            flops=flops,
            transcendentals=Mp * Hp,
            bytes_accessed=bytes_accessed,
        ),
    )(x2, w1p, b1p, w2p, b2p)

    return out2[:M, :D].reshape(B, S, D)


def ffn_ref(x, w1, b1, w2, b2):
    """bf16-operand / f32-accumulate reference matching the kernel's numerics."""
    B, S, D = x.shape
    xb = x.reshape(-1, D).astype(jnp.bfloat16)
    h = jnp.dot(xb, w1.astype(jnp.bfloat16),
                preferred_element_type=jnp.float32) + b1
    h = h * jax.nn.sigmoid(h)
    out = jnp.dot(h.astype(jnp.bfloat16), w2.astype(jnp.bfloat16),
                  preferred_element_type=jnp.float32) + b2
    return out.reshape(B, S, -1)


if __name__ == "__main__":
    batch, seq = 2, 8
    input_dim, hidden_dim = 32, 64

    key = jax.random.PRNGKey(0)
    kx, k1, k2, k3, k4 = jax.random.split(key, 5)

    x = jax.random.normal(kx, (batch, seq, input_dim), dtype=jnp.float32)

    # Deterministic Linear-style init (uniform +- 1/sqrt(fan_in)), like nn.Linear.
    bound1 = 1.0 / jnp.sqrt(input_dim)
    w1 = jax.random.uniform(k1, (input_dim, hidden_dim), jnp.float32, -bound1, bound1)
    b1 = jax.random.uniform(k2, (hidden_dim,), jnp.float32, -bound1, bound1)
    bound2 = 1.0 / jnp.sqrt(hidden_dim)
    w2 = jax.random.uniform(k3, (hidden_dim, input_dim), jnp.float32, -bound2, bound2)
    b2 = jax.random.uniform(k4, (input_dim,), jnp.float32, -bound2, bound2)

    # One-time weight prep (pad + bf16 cast), outside the hot path.
    w1p, b1p, w2p, b2p = prepare_ffn_params(w1, b1, w2, b2)

    out = positionwise_ffn(x, w1p, b1p, w2p, b2p)
    out = jax.block_until_ready(out)

    ref = ffn_ref(x, w1, b1, w2, b2)
    assert out.shape == (batch, seq, input_dim)
    max_err = float(jnp.max(jnp.abs(out - ref)))
    assert jnp.allclose(out, ref, atol=3e-2, rtol=3e-2), f"max_err={max_err}"

    print("KERNEL_OK")
</pallas_src>

<mosaic_0001>
module attributes {stable_mosaic.version = 11 : i64} {
  func.func @ffn_kernel(%arg0: i32, %arg1: memref<8x128xbf16, #tpu.memory_space<vmem>>, %arg2: memref<128x128xbf16, #tpu.memory_space<vmem>>, %arg3: memref<1x128xf32, #tpu.memory_space<vmem>>, %arg4: memref<128x128xbf16, #tpu.memory_space<vmem>>, %arg5: memref<1x128xf32, #tpu.memory_space<vmem>>, %arg6: memref<8x128xf32, #tpu.memory_space<vmem>>) attributes {dimension_semantics = [#tpu.dimension_semantics<parallel>], iteration_bounds = array<i64: 2>, scalar_prefetch = 0 : i64, scratch_operands = 0 : i64, tpu.core_type = #tpu.core_type<tc>, window_params = [{transform_indices = @transform_0, window_bounds = array<i64: 8, 128>}, {pipeline_mode = #tpu.pipeline_mode<synchronous>, transform_indices = @transform_1, window_bounds = array<i64: 128, 128>}, {pipeline_mode = #tpu.pipeline_mode<synchronous>, transform_indices = @transform_2, window_bounds = array<i64: 1, 128>}, {pipeline_mode = #tpu.pipeline_mode<synchronous>, transform_indices = @transform_3, window_bounds = array<i64: 128, 128>}, {pipeline_mode = #tpu.pipeline_mode<synchronous>, transform_indices = @transform_4, window_bounds = array<i64: 1, 128>}, {transform_indices = @transform_5, window_bounds = array<i64: 8, 128>}]} {
    %c0 = arith.constant 0 : index
    %c0_0 = arith.constant 0 : index
    %0 = vector.load %arg1[%c0, %c0_0] : memref<8x128xbf16, #tpu.memory_space<vmem>>, vector<8x128xbf16>
    %c0_1 = arith.constant 0 : index
    %c0_2 = arith.constant 0 : index
    %1 = vector.load %arg2[%c0_1, %c0_2] : memref<128x128xbf16, #tpu.memory_space<vmem>>, vector<128x128xbf16>
    %cst = arith.constant dense<0.000000e+00> : vector<8x128xf32>
    %2 = tpu.matmul %0, %1, %cst {dimension_numbers = #tpu.dot_dimension_numbers<[1], [0], [0], [1], [0, 0, 1, 1], [], []>} : vector<8x128xbf16>, vector<128x128xbf16>, vector<8x128xf32> -> vector<8x128xf32>
    %c0_3 = arith.constant 0 : index
    %c0_4 = arith.constant 0 : index
    %3 = vector.load %arg3[%c0_3, %c0_4] : memref<1x128xf32, #tpu.memory_space<vmem>>, vector<1x128xf32>
    %4 = vector.broadcast %3 : vector<1x128xf32> to vector<8x128xf32>
    %5 = arith.addf %2, %4 : vector<8x128xf32>
    %cst_5 = arith.constant 0.000000e+00 : f32
    %6 = vector.broadcast %cst_5 : f32 to vector<8x128xf32>
    %7 = arith.subf %6, %5 : vector<8x128xf32>
    %8 = math.exp %7 : vector<8x128xf32>
    %cst_6 = arith.constant 1.000000e+00 : f32
    %9 = vector.broadcast %cst_6 : f32 to vector<8x128xf32>
    %10 = arith.addf %9, %8 : vector<8x128xf32>
    %11 = tpu.reciprocal %10 {approx = true} : vector<8x128xf32> -> vector<8x128xf32>
    %12 = arith.mulf %5, %11 : vector<8x128xf32>
    %13 = arith.truncf %12 : vector<8x128xf32> to vector<8x128xbf16>
    %c0_7 = arith.constant 0 : index
    %c0_8 = arith.constant 0 : index
    %14 = vector.load %arg4[%c0_7, %c0_8] : memref<128x128xbf16, #tpu.memory_space<vmem>>, vector<128x128xbf16>
    %cst_9 = arith.constant dense<0.000000e+00> : vector<8x128xf32>
    %15 = tpu.matmul %13, %14, %cst_9 {dimension_numbers = #tpu.dot_dimension_numbers<[1], [0], [0], [1], [0, 0, 1, 1], [], []>} : vector<8x128xbf16>, vector<128x128xbf16>, vector<8x128xf32> -> vector<8x128xf32>
    %c0_10 = arith.constant 0 : index
    %c0_11 = arith.constant 0 : index
    %16 = vector.load %arg5[%c0_10, %c0_11] : memref<1x128xf32, #tpu.memory_space<vmem>>, vector<1x128xf32>
    %17 = vector.broadcast %16 : vector<1x128xf32> to vector<8x128xf32>
    %18 = arith.addf %15, %17 : vector<8x128xf32>
    %c0_12 = arith.constant 0 : index
    %c0_13 = arith.constant 0 : index
    %19 = vector.load %arg6[%c0_12, %c0_13] : memref<8x128xf32, #tpu.memory_space<vmem>>, vector<8x128xf32>
    tpu.vector_store %arg6[%c0_12, %c0_13], %18 {strides = array<i32>} : memref<8x128xf32, #tpu.memory_space<vmem>>, vector<8x128xf32>,
    return
  }
  func.func @transform_0(%arg0: i32) -> (i32, i32) {
    %c0_i32 = arith.constant 0 : i32
    %c0_i32_0 = arith.constant 0 : i32
    return %arg0, %c0_i32 : i32, i32
  }
  func.func @transform_1(%arg0: i32) -> (i32, i32) {
    %c0_i32 = arith.constant 0 : i32
    %c0_i32_0 = arith.constant 0 : i32
    %c0_i32_1 = arith.constant 0 : i32
    return %c0_i32, %c0_i32_0 : i32, i32
  }
  func.func @transform_2(%arg0: i32) -> (i32, i32) {
    %c0_i32 = arith.constant 0 : i32
    %c0_i32_0 = arith.constant 0 : i32
    %c0_i32_1 = arith.constant 0 : i32
    return %c0_i32, %c0_i32_0 : i32, i32
  }
  func.func @transform_3(%arg0: i32) -> (i32, i32) {
    %c0_i32 = arith.constant 0 : i32
    %c0_i32_0 = arith.constant 0 : i32
    %c0_i32_1 = arith.constant 0 : i32
    return %c0_i32, %c0_i32_0 : i32, i32
  }
  func.func @transform_4(%arg0: i32) -> (i32, i32) {
    %c0_i32 = arith.constant 0 : i32
    %c0_i32_0 = arith.constant 0 : i32
    %c0_i32_1 = arith.constant 0 : i32
    return %c0_i32, %c0_i32_0 : i32, i32
  }
  func.func @transform_5(%arg0: i32) -> (i32, i32) {
    %c0_i32 = arith.constant 0 : i32
    %c0_i32_0 = arith.constant 0 : i32
    return %arg0, %c0_i32 : i32, i32
  }
}

</mosaic_0001>

<bundles_post_ra>
// kernel: positionwise_ffn.1
= control target key start
LH: loop header
LB: loop body
LE: loop exit
PB: predicated region body
PF: predicated region fallthrough
CT: control target
= control target key end

     0   :  { %10 = vsyncpa [#allocation3], 0  ;;  %s796_s0 = inlined_call_operand.vmem [shape: bf16[16,128], index: 0, kind: input, shape index: {}]   ;;  %s797_s1 = inlined_call_operand.hbm [shape: bf16[128,128], index: 1, kind: input, shape index: {}]   ;;  %s798_s2 = inlined_call_operand.vmem [shape: f32[1,128], index: 2, kind: input, shape index: {}]   ;;  %s799_s3 = inlined_call_operand.hbm [shape: bf16[128,128], index: 3, kind: input, shape index: {}]   ;;  %s800_s4 = inlined_call_operand.vmem [shape: f32[1,128], index: 4, kind: input, shape index: {}]   ;;  %s801_s5 = inlined_call_operand.vmem [shape: f32[16,128], index: 5, kind: output, shape index: {}]  }
   0x1   :  { %11 = vsyncpa [#allocation5], 0  ;;  %s740_s18 = smov 0  }
   0x2 LB: > { %s169_s21 = sshll.u32 %s797_s1, 4  ;;  %s749_s22 = sadd.s32 4294967295, %s704_s18   ;;  %s704_s18 = sphi %s740_s18, %s17_s18   ;;  %s170_s21 = int_to_ptr.hbm [resolvable:$true] %s169_s21 }
   0x3   : > { %p502_p0 = scmp.ge.s32.totalorder %s704_s18, 1  ;;  %p158_p1 = scmp.lt.s32.totalorder %s704_s18, 3 }
   0x4   : > { %p608_p2 = scmp.eq.s32.totalorder %s749_s22, 0  ;;  %s706_s24 = smov [#allocation2]  }
   0x5   : > { %p754_p3 = pnand %p502_p0, %p158_p1  ;;  %s171_s25 = sshll.u32 %s706_s24, 4  ;;  %s172_s25 = int_to_ptr.vmem [resolvable:$true] %s171_s25 }
   0x6   : > { %s186_s28 = sshll.u32 %s799_s3, 4  ;;  %s707_s29 = smov [#allocation4]   ;;  %s187_s28 = int_to_ptr.hbm [resolvable:$true] %s186_s28 }
   0x7   : > { %p601_p4 = pneg %p754_p3  ;;  %s188_s30 = sshll.u32 %s707_s29, 4  ;;  %s189_s30 = int_to_ptr.vmem [resolvable:$true] %s188_s30 }
   0x8   : > { %s708_s6 = smov 64   ;;  %s709_s7 = smov 4  }
   0x9   : > { %p602_p5 = pnand %p608_p2, %p601_p4  ;;  %214 = sbr.rel (%p754_p3) target bundleno = 335 (0x14f), region = 40 }
   0xb   : > { %604 = dma.hbm_to_vmem [thread:$0]  (!%p602_p5), %s170_s21, 1024, %s172_s25, [#allocation3], %s708_s6, %s708_s6, %s709_s7  }
   0xc   : > { %607 = dma.hbm_to_vmem [thread:$0]  (!%p602_p5), %s187_s28, 1024, %s189_s30, [#allocation5], %s708_s6, %s708_s6, %s709_s7  }
   0xe   : > { %695 = dma.done.wait (%p608_p2), [#allocation3], 1024  }
   0xf   : > { %697 = vsyncadd (%p608_p2), [#allocation3], 4294966272 }
  0x10   : > { %699 = dma.done.wait (%p608_p2), [#allocation5], 1024  }
  0x11   : > { %701 = vsyncadd (%p608_p2), [#allocation5], 4294966272  ;;  %v584_v0 = vld [vmem:[#allocation2 + $0x38] sm:$0xff]  ;;  %v583_v1 = vld [vmem:[#allocation2 + $0x30] sm:$0xff]  ;;  %p246_p6 = scmp.lt.s32.totalorder %s749_s22, 1 }
  0x12   : > { %323 = vmatpush.bf16.msra.mxu0 %v584_v0  ;;  %v592_v2 = vld [vmem:[#allocation4 + $0x38] sm:$0xff]  ;;  %v582_v3 = vld [vmem:[#allocation2 + $0x28] sm:$0xff]  ;;  %v581_v4 = vld [vmem:[#allocation2 + $0x20] sm:$0xff] }
  0x13   : > { %411 = vmatpush.bf16.msra.mxu1 %v592_v2  ;;  %v580_v5 = vld [vmem:[#allocation2 + $0x18] sm:$0xff]  ;;  %v579_v6 = vld [vmem:[#allocation2 + $0x10] sm:$0xff]  ;;  %s804_s22 = smov (!%p246_p6, %s749_s22), 1  ;;  %v578_v7 = vld [vmem:[#allocation2 + $0x8] sm:$0xff] }
  0x14   : > { %s509_s8 = sshll.u32 %s804_s22, 2  ;;  %v577_v8 = vld [vmem:[#allocation2] sm:$0xff]  ;;  %v591_v10 = vld [vmem:[#allocation4 + $0x30] sm:$0xff]  ;;  %v590_v11 = vld [vmem:[#allocation4 + $0x28] sm:$0xff]  ;;  %s510_s14 = sshll.u32 %s804_s22, 3 }
  0x15   : > { %s249_s11 = scalar_lea.vmem %s796_s0, %s509_s8  ;;  %v589_v12 = vld [vmem:[#allocation4 + $0x20] sm:$0xff]  ;;  %v588_v13 = vld [vmem:[#allocation4 + $0x18] sm:$0xff]  ;;  %v587_v14 = vld [vmem:[#allocation4 + $0x10] sm:$0xff]  ;;  %s253_s20 = scalar_lea.vmem %s801_s5, %s510_s14 }
  0x16   : > { %324 = vmatpush.bf16.msra.mxu0 %v583_v1  ;;  %v254_v9 = vld [vmem:[%s249_s11] sm:$0xf]  ;;  %v586_v15 = vld [vmem:[#allocation4 + $0x8] sm:$0xff] }
  0x17   : > { %412 = vmatpush.bf16.msra.mxu1 %v591_v10  ;;  %v585_v16 = vld [vmem:[#allocation4] sm:$0xff] }
  0x18   : > { %v624_v17 = vld [vmem:[%s798_s2] ss:$0 sm:$0xff] }
  0x19   : > { %v625_v28 = vld [vmem:[%s800_s4] ss:$0 sm:$0xff] }
  0x1a   : > { %325 = vmatpush.bf16.msra.mxu0 %v582_v3 }
  0x1b   : > { %413 = vmatpush.bf16.msra.mxu1 %v590_v11 }
  0x1e   : > { %326 = vmatpush.bf16.msra.mxu0 %v581_v4 }
  0x1f   : > { %414 = vmatpush.bf16.msra.mxu1 %v589_v12 }
  0x22   : > { %327 = vmatpush.bf16.msra.mxu0 %v580_v5 }
  0x23   : > { %415 = vmatpush.bf16.msra.mxu1 %v588_v13 }
  0x26   : > { %328 = vmatpush.bf16.msra.mxu0 %v579_v6 }
  0x27   : > { %416 = vmatpush.bf16.msra.mxu1 %v587_v14 }
  0x2a   : > { %329 = vmatpush.bf16.msra.mxu0 %v578_v7 }
  0x2b   : > { %417 = vmatpush.bf16.msra.mxu1 %v586_v15 }
  0x2e   : > { %330 = vmatpush.bf16.msra.mxu0 %v577_v8 }
  0x2f   : > { %418 = vmatpush.bf16.msra.mxu1 %v585_v16 }
  0x31   : > { %331 = vmatmul.bf16.vlgmr.msra.gmra.mxu0 %v254_v9 }
  0xae   : > { %v332_v18 = vpop.f32.mrf.mxu0 }
  0xaf   : > { %v333_v19 = vadd.f32 %v624_v17, %v332_v18 }
  0xb1   : > { %v336_v20 = vsub.f32 0.0, %v333_v19 }
  0xb3   : > { %v337_v21 = vmul.f32 1.442695, %v336_v20 }
  0xb5   : > { %626 = vpow2.f32 %v337_v21 }
  0xb6   : > { %v334_v22 = vpop.f32.mrf.mxu0 }
  0xbb   : > { %v627_v23 = vpop.eup %626 }
  0xbc   : > { %v339_v24 = vadd.f32 1.0, %v627_v23 }
  0xbe   : > { %628 = vrcp.f32 %v339_v24 }
  0xc4   : > { %v629_v25 = vpop.eup %628 }
  0xc5   : > { %v341_v26 = vmul.f32 %v629_v25, %v333_v19 }
  0xc7   : > { %v342_v27 = vpack.c.bf16 %v341_v26, %v341_v26 }
  0xc9   : > { %419 = vmatmul.bf16.vlgmr.msra.gmra.mxu1 %v342_v27 }
 0x146   : > { %v420_v29 = vpop.f32.mrf.mxu1 }
 0x147   : > { %v421_v30 = vadd.f32 %v625_v28, %v420_v29 }
 0x149   : > { %424 = vst [vmem:[%s253_s20] sm:$0xff] %v421_v30 }
 0x14e   : > { %v422_v31 = vpop.f32.mrf.mxu1 }
 0x14f PF: > { %s17_s18 = sadd.s32 1, %s704_s18  }
 0x150   : > { %p14_p7 = scmp.ge.s32.totalorder %s17_s18, 4  }
 0x152   :  { %16 = sbr.rel (!%p14_p7) target bundleno = 2 (0x2), region = 79 }
 0x157   :  { %444 = vsyncpa [#allocation3], 1 }
 0x158   :  { %446 = vsyncpa [#allocation3 + $0x1], 1 }
 0x159   :  { %447 = vsyncpa [#allocation5], 1 }

</bundles_post_ra>
